<compile_context>
chip_gen: v7x
topology: tpu7x:2x2x1
jax: 0.10.0
libtpu: 0.0.40
codegen_flags: <defaults>
</compile_context>

<pallas_src>
import functools
import math

import jax
import jax.numpy as jnp
from jax import lax
from jax.experimental import pallas as pl
from jax.experimental.pallas import tpu as pltpu


def _round_up(x, m):
    return ((x + m - 1) // m) * m


def _nchw_to_nhwc(x):
    return jnp.transpose(x, (0, 2, 3, 1))


def _nhwc_to_nchw(x):
    return jnp.transpose(x, (0, 3, 1, 2))


# ----------------------------------------------------------------------------
# MXU matmul kernel: bf16 operands, f32 accumulator, fused bias + activation
# and (optionally) fused per-instance normalization (+ReLU) in the epilogue.
# ----------------------------------------------------------------------------

_FUSE_IN_MAX_M = 4096   # max rows kept resident for the fused-instance-norm path
_IN_EPS = 1e-5          # nn.InstanceNorm2d default


def _mm_kernel(a_ref, w_ref, b_ref, o_ref, acc_ref, *, nk, act,
               in_groups, in_relu):
    k = pl.program_id(2)

    @pl.when(k == 0)
    def _():
        acc_ref[...] = jnp.zeros_like(acc_ref)

    acc_ref[...] += jnp.dot(a_ref[...], w_ref[...],
                            preferred_element_type=jnp.float32)

    @pl.when(k == nk - 1)
    def _():
        r = acc_ref[...] + b_ref[...]
        if act == "tanh":
            r = jnp.tanh(r)
        elif act == "sigmoid":
            r = jax.nn.sigmoid(r)
        elif act == "relu":
            r = jnp.maximum(r, 0.0)
        if in_groups is not None:
            # Fused InstanceNorm2d: rows are (instance-major, spatial-minor);
            # stats are per channel (column) over each instance's spatial rows.
            hw = r.shape[0] // in_groups
            parts = []
            for g in range(in_groups):
                rg = r[g * hw:(g + 1) * hw, :]
                mu = jnp.mean(rg, axis=0, keepdims=True)
                var = jnp.mean(jnp.square(rg - mu), axis=0, keepdims=True)
                parts.append((rg - mu) * lax.rsqrt(var + _IN_EPS))
            r = jnp.concatenate(parts, axis=0)
            if in_relu:
                r = jnp.maximum(r, 0.0)
        o_ref[...] = r.astype(o_ref.dtype)


@functools.lru_cache(maxsize=None)
def _matmul_call(M_pad, K_pad, N_pad, TM, TK, TN, act, in_groups, in_relu):
    nm = pl.cdiv(M_pad, TM)
    nn = N_pad // TN
    nk = K_pad // TK
    kern = functools.partial(_mm_kernel, nk=nk, act=act,
                             in_groups=in_groups, in_relu=in_relu)
    call = pl.pallas_call(
        kern,
        out_shape=jax.ShapeDtypeStruct((M_pad, N_pad), jnp.float32),
        grid_spec=pltpu.PrefetchScalarGridSpec(
            num_scalar_prefetch=0,
            grid=(nm, nn, nk),
            in_specs=[
                pl.BlockSpec((TM, TK), lambda m, n, k: (m, k)),
                pl.BlockSpec((TK, TN), lambda m, n, k: (k, n)),
                pl.BlockSpec((1, TN), lambda m, n, k: (0, n)),
            ],
            out_specs=pl.BlockSpec((TM, TN), lambda m, n, k: (m, n)),
            scratch_shapes=[pltpu.VMEM((TM, TN), jnp.float32)],
        ),
        compiler_params=pltpu.CompilerParams(
            dimension_semantics=("parallel", "parallel", "arbitrary")),
    )
    return jax.jit(call)


def matmul_bias_act(a, wm, bias_row, n_out, act="none",
                    in_groups=None, in_relu=False):
    """(M, K) @ pre-packed bf16 (K_pad, N_pad) weights with fused epilogue."""
    M, K = a.shape
    K_pad, N_pad = wm.shape
    a = a.astype(jnp.bfloat16)

    if in_groups is not None:
        assert (M % in_groups == 0 and (M // in_groups) % 8 == 0
                and M <= _FUSE_IN_MAX_M)
        M_pad = M
        TM = M
    else:
        M_pad = _round_up(M, 8)
        TM = min(512, M_pad)

    if M_pad != M or K_pad != K:
        a = jnp.pad(a, ((0, M_pad - M), (0, K_pad - K)))

    if K_pad <= 1024:
        TK = K_pad
    else:
        TK = 128
        for cand in range(1024, 127, -128):
            if K_pad % cand == 0:
                TK = cand
                break
    TN = 256 if N_pad % 256 == 0 else 128

    call = _matmul_call(M_pad, K_pad, N_pad, TM, TK, TN, act,
                        in_groups, in_relu)
    out = call(a, wm, bias_row)
    return out[:M, :n_out]


# ----------------------------------------------------------------------------
# Weight pre-packing (transpose + pad + bf16 cast done once at param creation)
# ----------------------------------------------------------------------------

def _pack_matmul(w_kn, b=None):
    K, N = w_kn.shape
    K_pad = _round_up(K, 128)
    N_pad = _round_up(N, 128)
    wm = jnp.zeros((K_pad, N_pad), jnp.bfloat16)
    wm = wm.at[:K, :N].set(w_kn.astype(jnp.bfloat16))
    if b is None:
        b = jnp.zeros((N,), jnp.float32)
    br = jnp.zeros((1, N_pad), jnp.float32).at[0, :N].set(b.astype(jnp.float32))
    return {"wm": wm, "b": br, "k": K, "n": N}


def _pack_conv(w_oihw, b=None):
    O, I, kh, kw = w_oihw.shape
    w_kn = jnp.transpose(w_oihw, (2, 3, 1, 0)).reshape(kh * kw * I, O)
    d = _pack_matmul(w_kn, b)
    d.update({"kh": kh, "kw": kw, "cin": I, "cout": O})
    return d


# ----------------------------------------------------------------------------
# Standalone instance-norm (fallback only, when the fused epilogue can't apply)
# ----------------------------------------------------------------------------

def _instnorm_kernel(x_ref, o_ref, *, relu):
    x = x_ref[...]                                    # (1, H*W, C)
    mean = jnp.mean(x, axis=1, keepdims=True)
    var = jnp.mean(jnp.square(x - mean), axis=1, keepdims=True)
    y = (x - mean) * lax.rsqrt(var + _IN_EPS)
    if relu:
        y = jnp.maximum(y, 0.0)
    o_ref[...] = y


def instance_norm(x_nhwc, relu=False):
    B, H, W, C = x_nhwc.shape
    x3 = x_nhwc.reshape(B, H * W, C).astype(jnp.float32)
    out = pl.pallas_call(
        functools.partial(_instnorm_kernel, relu=relu),
        out_shape=jax.ShapeDtypeStruct((B, H * W, C), jnp.float32),
        grid=(B,),
        in_specs=[pl.BlockSpec((1, H * W, C), lambda b: (b, 0, 0))],
        out_specs=pl.BlockSpec((1, H * W, C), lambda b: (b, 0, 0)),
    )(x3)
    return out.reshape(B, H, W, C)


# ----------------------------------------------------------------------------
# Conv-as-matmul glue (1x1 convs skip im2col; k>1 im2col stays in bf16)
# ----------------------------------------------------------------------------

def _im2col(x_nhwc, kh, kw, stride, pad):
    B, H, W, C = x_nhwc.shape
    xp = jnp.pad(x_nhwc, ((0, 0), (pad, pad), (pad, pad), (0, 0)))
    Ho = (H + 2 * pad - kh) // stride + 1
    Wo = (W + 2 * pad - kw) // stride + 1
    cols = []
    for i in range(kh):
        for j in range(kw):
            cols.append(xp[:, i:i + stride * Ho:stride,
                           j:j + stride * Wo:stride, :])
    col = jnp.concatenate(cols, axis=-1)              # (B, Ho, Wo, kh*kw*C)
    return col.reshape(B * Ho * Wo, kh * kw * C), (B, Ho, Wo)


def conv2d(x_nhwc, pk, stride=1, pad=0, act="none",
           inorm=False, inorm_relu=False):
    kh, kw, cin, cout = pk["kh"], pk["kw"], pk["cin"], pk["cout"]
    B = x_nhwc.shape[0]
    x = x_nhwc.astype(jnp.bfloat16)
    if kh == 1 and kw == 1 and pad == 0:
        if stride > 1:
            x = x[:, ::stride, ::stride, :]
        _, Ho, Wo, _ = x.shape
        a = x.reshape(B * Ho * Wo, cin)
    else:
        a, (B, Ho, Wo) = _im2col(x, kh, kw, stride, pad)
    M = B * Ho * Wo
    hw = Ho * Wo
    fuse = inorm and (hw % 8 == 0) and (M % 8 == 0) and (M <= _FUSE_IN_MAX_M)
    out = matmul_bias_act(a, pk["wm"], pk["b"], cout, act=act,
                          in_groups=(B if fuse else None),
                          in_relu=inorm_relu)
    out = out.reshape(B, Ho, Wo, cout)
    if inorm and not fuse:
        out = instance_norm(out, relu=inorm_relu)
    return out


# ----------------------------------------------------------------------------
# Row-tiled, lane-dense elementwise / partial-reduction kernels
# ----------------------------------------------------------------------------

_EW_TILE_ROWS = 1024


def _flatten_lanes(a):
    size = a.size
    cols = 128 if size % 128 == 0 else a.shape[-1]
    return a.reshape(size // cols, cols)


def _log_mag_kernel(re_ref, im_ref, o_ref):
    mag = jnp.sqrt(re_ref[...] ** 2 + im_ref[...] ** 2)
    o_ref[...] = 20.0 * jnp.log(mag + 1e-7) / 255.0


def _abs_diff_kernel(a_ref, b_ref, o_ref):
    o_ref[...] = jnp.abs(a_ref[...] - b_ref[...])


def _elemwise_tiled(kernel, *arrs):
    shape = arrs[0].shape
    flat = [_flatten_lanes(a.astype(jnp.float32)) for a in arrs]
    R, C = flat[0].shape
    TR = R if R <= _EW_TILE_ROWS else _EW_TILE_ROWS
    out = pl.pallas_call(
        kernel,
        out_shape=jax.ShapeDtypeStruct((R, C), jnp.float32),
        grid=(pl.cdiv(R, TR),),
        in_specs=[pl.BlockSpec((TR, C), lambda i: (i, 0)) for _ in flat],
        out_specs=pl.BlockSpec((TR, C), lambda i: (i, 0)),
    )(*flat)
    return out.reshape(shape)


def log_magnitude(re, im):
    return _elemwise_tiled(_log_mag_kernel, re, im)


def abs_diff(a, b):
    return _elemwise_tiled(_abs_diff_kernel, a, b)


def _abs_partial_minmax_kernel(re_ref, im_ref, z_ref, mn_ref, mx_ref,
                               *, rows, tr):
    z = jnp.sqrt(re_ref[...] ** 2 + im_ref[...] ** 2)
    z_ref[...] = z
    ridx = lax.broadcasted_iota(jnp.int32, z.shape, 0) + pl.program_id(0) * tr
    valid = ridx < rows
    mn_ref[...] = jnp.min(jnp.where(valid, z, jnp.inf), axis=0, keepdims=True)
    mx_ref[...] = jnp.max(jnp.where(valid, z, -jnp.inf), axis=0, keepdims=True)


def _scale_div_kernel(z_ref, d_ref, o_ref):
    o_ref[...] = z_ref[...] / d_ref[...]


def abs_minmax_norm(re, im):
    """z = |re + i*im|; z / (max(z) - min(z))  (matches the PyTorch reference)."""
    shape = re.shape
    zre = _flatten_lanes(re.astype(jnp.float32))
    zim = _flatten_lanes(im.astype(jnp.float32))
    R, C = zre.shape
    TR = R if R <= _EW_TILE_ROWS else _EW_TILE_ROWS
    nt = pl.cdiv(R, TR)
    z, mns, mxs = pl.pallas_call(
        functools.partial(_abs_partial_minmax_kernel, rows=R, tr=TR),
        out_shape=(jax.ShapeDtypeStruct((R, C), jnp.float32),
                   jax.ShapeDtypeStruct((nt, C), jnp.float32),
                   jax.ShapeDtypeStruct((nt, C), jnp.float32)),
        grid=(nt,),
        in_specs=(pl.BlockSpec((TR, C), lambda i: (i, 0)),
                  pl.BlockSpec((TR, C), lambda i: (i, 0))),
        out_specs=(pl.BlockSpec((TR, C), lambda i: (i, 0)),
                   pl.BlockSpec((1, C), lambda i: (i, 0)),
                   pl.BlockSpec((1, C), lambda i: (i, 0))),
    )(zre, zim)
    denom = jnp.max(mxs) - jnp.min(mns)
    drow = jnp.broadcast_to(denom, (1, C)).astype(jnp.float32)
    out = pl.pallas_call(
        _scale_div_kernel,
        out_shape=jax.ShapeDtypeStruct((R, C), jnp.float32),
        grid=(nt,),
        in_specs=(pl.BlockSpec((TR, C), lambda i: (i, 0)),
                  pl.BlockSpec((1, C), lambda i: (0, 0))),
        out_specs=pl.BlockSpec((TR, C), lambda i: (i, 0)),
    )(z, drow)
    return out.reshape(shape)


# ----------------------------------------------------------------------------
# ESPCN / fft_filter
# ----------------------------------------------------------------------------

def make_espcn_params(key):
    k = jax.random.split(key, 4)
    std1 = math.sqrt(2.0 / (64 * 5 * 5))
    std2 = math.sqrt(2.0 / (32 * 3 * 3))
    w1 = std1 * jax.random.normal(k[0], (64, 3, 5, 5), jnp.float32)
    w2 = std2 * jax.random.normal(k[1], (32, 64, 3, 3), jnp.float32)
    w3h = 0.001 * jax.random.normal(k[2], (1, 32, 3, 3), jnp.float32)
    w3l = 0.001 * jax.random.normal(k[3], (1, 32, 3, 3), jnp.float32)
    return {"c1": _pack_conv(w1), "c2": _pack_conv(w2),
            "c3h": _pack_conv(w3h), "c3l": _pack_conv(w3l)}


def espcn_forward(x_nhwc, p):
    # BatchNorm2d(3), training-mode batch statistics, gamma=1, beta=0 (glue).
    mean = jnp.mean(x_nhwc, axis=(0, 1, 2), keepdims=True)
    var = jnp.mean(jnp.square(x_nhwc - mean), axis=(0, 1, 2), keepdims=True)
    x = (x_nhwc - mean) / jnp.sqrt(var + 1e-5)
    x = conv2d(x, p["c1"], stride=1, pad=2, act="tanh")
    x = conv2d(x, p["c2"], stride=1, pad=1, act="tanh")
    # PixelShuffle(upscale_factor=1) is the identity.
    x_h = conv2d(x, p["c3h"], stride=1, pad=1, act="sigmoid")
    x_l = conv2d(x, p["c3l"], stride=1, pad=1, act="sigmoid")
    return x_h, x_l


def fft_filter_forward(image_nchw, espcn_p):
    # TODO(synk): FFT / fftshift / ifft have no Pallas equivalent; they stay in jnp.
    freq = jnp.fft.fftn(image_nchw * 255.0, axes=(-2, -1))
    freq = jnp.fft.fftshift(freq, axes=(-2, -1))
    log_mag = log_magnitude(jnp.real(freq), jnp.imag(freq))
    m_h, m_l = espcn_forward(_nchw_to_nhwc(log_mag), espcn_p)
    mask_mid_frq = _nhwc_to_nchw(m_h)            # (B,1,H,W)
    mask_mid_filterd = _nhwc_to_nchw(m_l)        # (B,1,H,W)

    def filt(mask):
        mf = freq * mask.astype(freq.dtype)
        mf = jnp.fft.ifftshift(mf, axes=(-2, -1))
        rec = jnp.fft.ifftn(mf, axes=(-2, -1))
        return abs_minmax_norm(jnp.real(rec), jnp.imag(rec))

    middle_freq_image = filt(mask_mid_frq)
    middle_filtered_image = filt(mask_mid_filterd)
    return (middle_freq_image, middle_filtered_image,
            mask_mid_frq, mask_mid_filterd)


# ----------------------------------------------------------------------------
# VAE surrogate (deterministic stand-in for the SD-1.5 AutoencoderKL)
# ----------------------------------------------------------------------------

def make_vae_params(key):
    k1, k2 = jax.random.split(key)
    enc_w = 0.05 * jax.random.normal(k1, (4, 3, 8, 8), jnp.float32)
    dec_w = 0.05 * jax.random.normal(k2, (3 * 64, 4, 1, 1), jnp.float32)
    return {"enc": _pack_conv(enc_w), "dec": _pack_conv(dec_w)}


def vae_reconstruct(x_nhwc, vp):
    # encode -> 4-channel latent at 1/8 resolution (== retrieve_latents output)
    latents = conv2d(x_nhwc, vp["enc"], stride=8, pad=0)
    # decode -> depth-to-space back to full resolution, 3 channels
    y = conv2d(latents, vp["dec"], stride=1, pad=0)
    B, h, w, _ = y.shape
    y = y.reshape(B, h, w, 8, 8, 3).transpose(0, 1, 3, 2, 4, 5)
    return y.reshape(B, h * 8, w * 8, 3)


# ----------------------------------------------------------------------------
# ResNet-50 (instance norm, 6-channel "frq" conv1, fc 2048 -> 1)
# ----------------------------------------------------------------------------

def _kaiming(key, shape):          # OIHW, kaiming_normal fan_out
    O, I, kh, kw = shape
    std = math.sqrt(2.0 / (O * kh * kw))
    return std * jax.random.normal(key, shape, jnp.float32)


def make_resnet_params(key):
    keys = jax.random.split(key, 64)
    ki = iter(keys)
    w3 = _kaiming(next(ki), (64, 3, 7, 7))
    # frq mode: conv1.weight = cat([w * 0.25] * 2, dim=1) -> 6 input channels
    conv1_w = jnp.concatenate([0.25 * w3, 0.25 * w3], axis=1)
    layers_cfg = [(64, 3, 1), (128, 4, 2), (256, 6, 2), (512, 3, 2)]
    inplanes = 64
    layers = []
    for planes, nblocks, stride in layers_cfg:
        blocks = []
        for bi in range(nblocks):
            s = stride if bi == 0 else 1
            blk = {
                "stride": s,
                "c1": _pack_conv(_kaiming(next(ki), (planes, inplanes, 1, 1))),
                "c2": _pack_conv(_kaiming(next(ki), (planes, planes, 3, 3))),
                "c3": _pack_conv(_kaiming(next(ki), (planes * 4, planes, 1, 1))),
            }
            if bi == 0:
                blk["cd"] = _pack_conv(
                    _kaiming(next(ki), (planes * 4, inplanes, 1, 1)))
            blocks.append(blk)
            inplanes = planes * 4
        layers.append(blocks)
    fc_w = 0.02 * jax.random.normal(next(ki), (1, 2048), jnp.float32)
    fc = _pack_matmul(fc_w.T, jnp.zeros((1,), jnp.float32))
    return {"conv1": _pack_conv(conv1_w), "layers": layers, "fc": fc}


def bottleneck_forward(x, blk):
    identity = x
    out = conv2d(x, blk["c1"], stride=1, pad=0, inorm=True, inorm_relu=True)
    out = conv2d(out, blk["c2"], stride=blk["stride"], pad=1,
                 inorm=True, inorm_relu=True)
    out = conv2d(out, blk["c3"], stride=1, pad=0, inorm=True, inorm_relu=False)
    if "cd" in blk:
        identity = conv2d(x, blk["cd"], stride=blk["stride"], pad=0,
                          inorm=True, inorm_relu=False)
    return jnp.maximum(out + identity, 0.0)      # residual add + ReLU (glue)


def resnet_forward(x_nhwc, rp):
    x = conv2d(x_nhwc, rp["conv1"], stride=2, pad=3,
               inorm=True, inorm_relu=True)
    x = lax.reduce_window(x, -jnp.inf, lax.max, (1, 3, 3, 1), (1, 2, 2, 1),
                          ((0, 0), (1, 1), (1, 1), (0, 0)))     # maxpool 3x3/2
    for blocks in rp["layers"]:
        for blk in blocks:
            x = bottleneck_forward(x, blk)
    feat = jnp.mean(x, axis=(1, 2))               # adaptive avg-pool -> (B,2048)
    return matmul_bias_act(feat, rp["fc"]["wm"], rp["fc"]["b"], 1)   # (B,1)


# ----------------------------------------------------------------------------
# FIRE_model forward
# ----------------------------------------------------------------------------

def fire_forward(x_nchw, params):
    espcn_p, vae_p, resnet_p = params["espcn"], params["vae"], params["resnet"]
    (middle_freq_image, middle_filtered_image,
     mask_mid_frq, mask_mid_filterd) = fft_filter_forward(x_nchw, espcn_p)

    x_nhwc = _nchw_to_nhwc(x_nchw)
    reconstructions_x = vae_reconstruct(x_nhwc, vae_p)
    reconstructions_filt = vae_reconstruct(
        _nchw_to_nhwc(middle_filtered_image), vae_p)

    raw_delta = abs_diff(reconstructions_x, x_nhwc)
    filt_delta = abs_diff(reconstructions_filt, x_nhwc)

    resnet_in = jnp.concatenate([raw_delta, filt_delta], axis=-1)   # 6 channels
    o = resnet_forward(resnet_in, resnet_p)

    return (o, middle_freq_image, _nhwc_to_nchw(raw_delta),
            mask_mid_frq, mask_mid_filterd)


if __name__ == "__main__":
    key = jax.random.PRNGKey(0)
    kx, ke, kv, kr = jax.random.split(key, 4)
    # NCHW image in [0,1], small shapes (the 256x256 in fft_filter only feeds
    # unused registered buffers, so any spatial size works).
    x = jax.random.uniform(kx, (2, 3, 64, 64), dtype=jnp.float32)
    params = {
        "espcn": make_espcn_params(ke),
        "vae": make_vae_params(kv),
        "resnet": make_resnet_params(kr),
    }
    outs = fire_forward(x, params)
    outs = jax.block_until_ready(outs)
    o, middle_freq_image, raw_delta, mask_frq, mask_filt = outs
    assert o.shape == (2, 1)
    assert middle_freq_image.shape == (2, 3, 64, 64)
    assert raw_delta.shape == (2, 3, 64, 64)
    assert mask_frq.shape == (2, 1, 64, 64)
    assert mask_filt.shape == (2, 1, 64, 64)
    assert all(bool(jnp.all(jnp.isfinite(t))) for t in
               (o, middle_freq_image, raw_delta, mask_frq, mask_filt))
    print("KERNEL_OK")
</pallas_src>

<mosaic_0001>
module attributes {stable_mosaic.version = 11 : i64} {
  func.func @_log_mag_kernel(%arg0: i32, %arg1: memref<192x128xf32, #tpu.memory_space<vmem>>, %arg2: memref<192x128xf32, #tpu.memory_space<vmem>>, %arg3: memref<192x128xf32, #tpu.memory_space<vmem>>) attributes {dimension_semantics = [#tpu.dimension_semantics<arbitrary>], iteration_bounds = array<i64: 1>, scalar_prefetch = 0 : i64, scratch_operands = 0 : i64, tpu.core_type = #tpu.core_type<tc>, window_params = [{transform_indices = @transform_0, window_bounds = array<i64: 192, 128>}, {transform_indices = @transform_1, window_bounds = array<i64: 192, 128>}, {transform_indices = @transform_2, window_bounds = array<i64: 192, 128>}]} {
    %c0 = arith.constant 0 : index
    %c0_0 = arith.constant 0 : index
    %0 = vector.load %arg1[%c0, %c0_0] : memref<192x128xf32, #tpu.memory_space<vmem>>, vector<192x128xf32>
    %1 = arith.mulf %0, %0 : vector<192x128xf32>
    %c0_1 = arith.constant 0 : index
    %c0_2 = arith.constant 0 : index
    %2 = vector.load %arg2[%c0_1, %c0_2] : memref<192x128xf32, #tpu.memory_space<vmem>>, vector<192x128xf32>
    %3 = arith.mulf %2, %2 : vector<192x128xf32>
    %4 = arith.addf %1, %3 : vector<192x128xf32>
    %5 = math.sqrt %4 : vector<192x128xf32>
    %cst = arith.constant 1.000000e-07 : f32
    %6 = vector.broadcast %cst : f32 to vector<192x128xf32>
    %7 = arith.addf %5, %6 : vector<192x128xf32>
    %8 = math.log %7 : vector<192x128xf32>
    %cst_3 = arith.constant 2.000000e+01 : f32
    %9 = vector.broadcast %cst_3 : f32 to vector<192x128xf32>
    %10 = arith.mulf %9, %8 : vector<192x128xf32>
    %cst_4 = arith.constant 2.550000e+02 : f32
    %11 = vector.broadcast %cst_4 : f32 to vector<192x128xf32>
    %12 = arith.divf %10, %11 : vector<192x128xf32>
    %c0_5 = arith.constant 0 : index
    %c0_6 = arith.constant 0 : index
    %13 = vector.load %arg3[%c0_5, %c0_6] : memref<192x128xf32, #tpu.memory_space<vmem>>, vector<192x128xf32>
    tpu.vector_store %arg3[%c0_5, %c0_6], %12 {strides = array<i32>} : memref<192x128xf32, #tpu.memory_space<vmem>>, vector<192x128xf32>,
    return
  }
  func.func @transform_0(%arg0: i32) -> (i32, i32) {
    %c0_i32 = arith.constant 0 : i32
    %c0_i32_0 = arith.constant 0 : i32
    return %arg0, %c0_i32 : i32, i32
  }
  func.func @transform_1(%arg0: i32) -> (i32, i32) {
    %c0_i32 = arith.constant 0 : i32
    %c0_i32_0 = arith.constant 0 : i32
    return %arg0, %c0_i32 : i32, i32
  }
  func.func @transform_2(%arg0: i32) -> (i32, i32) {
    %c0_i32 = arith.constant 0 : i32
    %c0_i32_0 = arith.constant 0 : i32
    return %arg0, %c0_i32 : i32, i32
  }
}

</mosaic_0001>

<bundles_post_ra>
// kernel: tpu_custom_call.1
= control target key start
LH: loop header
LB: loop body
LE: loop exit
PB: predicated region body
PF: predicated region fallthrough
CT: control target
= control target key end

     0   :  { %7 = vsyncpa [#allocation3], 0  ;;  %s1001_s0 = inlined_call_operand.hbm [shape: f32[192,128], index: 0, kind: input, shape index: {}]   ;;  %s1002_s1 = inlined_call_operand.hbm [shape: f32[192,128], index: 1, kind: input, shape index: {}]   ;;  %s1003_s2 = inlined_call_operand.hbm [shape: f32[192,128], index: 2, kind: output, shape index: {}]  }
   0x1   :  { %8 = vsyncpa [#allocation6], 0 }
   0x2   :  { %9 = vsyncpa [#allocation4], 0  ;;  %s664_s9 = smov [#allocation2]   ;;  %s592_s13 = scalar_lea.hbm %s1001_s0, 3072 }
   0x3   :  { %s15_s10 = sshll.u32 %s664_s9, 4  ;;  %p593_p0 = scmp.ne.s32.totalorder %s1001_s0, %s592_s13  ;;  %s16_s10 = int_to_ptr.vmem [resolvable:$true] %s15_s10 }
   0x4   :  { %p596_p1 = scmp.lt.u32.totalorder %s592_s13, %s1001_s0 }
   0x6   :  { %p598_p2 = pnand %p596_p1, %p593_p0 }
   0x8   :  { %601 = shalt.err (!%p598_p2)
}
   0x9   :  { %s602_s18 = scalar_lea.vmem %s16_s10, 3072  ;;  %p607_p4 = scmp.lt.s32.totalorder %s16_s10, %s16_s10 }
   0xa   :  { %p603_p3 = scmp.ne.s32.totalorder %s16_s10, %s602_s18  ;;  %p608_p5 = scmp.lt.s32.totalorder %s602_s18, %s602_s18 }
   0xc   :  { %p609_p6 = por %p608_p5, %p607_p4 }
   0xe   :  { %p610_p7 = pnand %p609_p6, %p603_p3 }
  0x10   :  { %613 = shalt.err (!%p610_p7)
}
  0x11   :  { %s665_s19 = smov 128   ;;  %s666_s20 = smov 8  }
  0x12   :  { %21 = dma.hbm_to_vmem [thread:$0]  %s1001_s0, 3072, %s16_s10, [#allocation3], %s665_s19, %s665_s19, %s666_s20  }
  0x13   :  { %s667_s23 = smov [#allocation5]   ;;  %s614_s27 = scalar_lea.hbm %s1002_s1, 3072 }
  0x14   :  { %s27_s24 = sshll.u32 %s667_s23, 4  ;;  %p615_p8 = scmp.ne.s32.totalorder %s1002_s1, %s614_s27  ;;  %s28_s24 = int_to_ptr.vmem [resolvable:$true] %s27_s24 }
  0x15   :  { %p618_p9 = scmp.lt.u32.totalorder %s614_s27, %s1002_s1 }
  0x17   :  { %p620_p10 = pnand %p618_p9, %p615_p8 }
  0x19   :  { %623 = shalt.err (!%p620_p10)
}
  0x1a   :  { %s624_s4 = scalar_lea.vmem %s28_s24, 3072  ;;  %p629_p12 = scmp.lt.s32.totalorder %s28_s24, %s28_s24 }
  0x1b   :  { %p625_p11 = scmp.ne.s32.totalorder %s28_s24, %s624_s4  ;;  %p630_p13 = scmp.lt.s32.totalorder %s624_s4, %s624_s4 }
  0x1d   :  { %p631_p0 = por %p630_p13, %p629_p12 }
  0x1f   :  { %p632_p1 = pnand %p631_p0, %p625_p11 }
  0x21   :  { %635 = shalt.err (!%p632_p1)
}
  0x22   :  { %33 = dma.hbm_to_vmem [thread:$0]  %s1002_s1, 3072, %s28_s24, [#allocation6], %s665_s19, %s665_s19, %s666_s20  }
  0x23   :  { %658 = dma.done.wait [#allocation3], 3072  }
  0x24   :  { %659 = vsyncadd [#allocation3], 4294964224 }
  0x25   :  { %660 = dma.done.wait [#allocation6], 3072  }
  0x26   :  { %661 = vsyncadd [#allocation6], 4294964224  ;;  %v40_v0 = vld [vmem:[#allocation2] sm:$0xff]  ;;  %v41_v2 = vld [vmem:[#allocation2 + $0x8] sm:$0xff]  ;;  %s668_s1 = smov [#allocation7]  }
  0x27   :  { %v88_v1 = vld [vmem:[#allocation5] sm:$0xff]  ;;  %v64_v3 = vmul.f32 %v40_v0, %v40_v0  ;;  %v65_v5 = vmul.f32 %v41_v2, %v41_v2  ;;  %v89_v6 = vld [vmem:[#allocation5 + $0x8] sm:$0xff]  ;;  %v42_v7 = vld [vmem:[#allocation2 + $0x10] sm:$0xff]  ;;  %s478_s6 = sshll.u32 %s668_s1, 4  ;;  %s479_s6 = int_to_ptr.vmem [resolvable:$true] %s478_s6 }
  0x28   :  { %v112_v4 = vmul.f32 %v88_v1, %v88_v1  ;;  %v90_v8 = vld [vmem:[#allocation5 + $0x10] sm:$0xff]  ;;  %v113_v9 = vmul.f32 %v89_v6, %v89_v6  ;;  %v66_v10 = vmul.f32 %v42_v7, %v42_v7  ;;  %v43_v12 = vld [vmem:[#allocation2 + $0x18] sm:$0xff]  ;;  %v44_v14 = vld [vmem:[#allocation2 + $0x20] sm:$0xff]  ;;  %s636_s7 = scalar_lea.vmem %s479_s6, 3072  ;;  %p641_p3 = scmp.lt.s32.totalorder %s479_s6, %s479_s6 }
  0x29   :  { %v114_v11 = vmul.f32 %v90_v8, %v90_v8  ;;  %v91_v13 = vld [vmem:[#allocation5 + $0x18] sm:$0xff]  ;;  %v67_v16 = vmul.f32 %v43_v12, %v43_v12  ;;  %v92_v18 = vld [vmem:[#allocation5 + $0x20] sm:$0xff]  ;;  %v68_v21 = vmul.f32 %v44_v14, %v44_v14  ;;  %v45_v23 = vld [vmem:[#allocation2 + $0x28] sm:$0xff]  ;;  %p637_p2 = scmp.ne.s32.totalorder %s479_s6, %s636_s7  ;;  %p642_p4 = scmp.lt.s32.totalorder %s636_s7, %s636_s7 }
  0x2a   :  { %v714_v15 = vadd.f32 %v112_v4, %v64_v3  ;;  %v115_v17 = vmul.f32 %v91_v13, %v91_v13  ;;  %v716_v19 = vadd.f32 %v113_v9, %v65_v5  ;;  %v116_v22 = vmul.f32 %v92_v18, %v92_v18  ;;  %v93_v24 = vld [vmem:[#allocation5 + $0x28] sm:$0xff]  ;;  %v46_v25 = vld [vmem:[#allocation2 + $0x30] sm:$0xff]  ;;  %v47_v27 = vld [vmem:[#allocation2 + $0x38] sm:$0xff] }
  0x2b   :  { %v718_v20 = vadd.f32 %v114_v11, %v66_v10  ;;  %v94_v26 = vld [vmem:[#allocation5 + $0x30] sm:$0xff]  ;;  %v95_v28 = vld [vmem:[#allocation5 + $0x38] sm:$0xff]  ;;  %v69_v29 = vmul.f32 %v45_v23, %v45_v23  ;;  %v117_v32 = vmul.f32 %v93_v24, %v93_v24  ;;  %v70_v33 = vmul.f32 %v46_v25, %v46_v25  ;;  %v48_v38 = vld [vmem:[#allocation2 + $0x40] sm:$0xff]  ;;  %p643_p5 = por %p642_p4, %p641_p3 }
  0x2c   :  { %496 = vrsqrt.f32 %v714_v15  ;;  %vm162_vm0 = vcmp.eq.f32.partialorder %v714_v15, inf  ;;  %vm164_vm1 = vcmp.eq.f32.partialorder %v714_v15, 0.0  ;;  %v725_v30 = vadd.f32 %v115_v17, %v67_v16  ;;  %v96_v40 = vld [vmem:[#allocation5 + $0x40] sm:$0xff]  ;;  %v49_v46 = vld [vmem:[#allocation2 + $0x48] sm:$0xff]  ;;  %v50_v48 = vld [vmem:[#allocation2 + $0x50] sm:$0xff] }
  0x2d   :  { %498 = vrsqrt.f32 %v716_v19  ;;  %v727_v31 = vadd.f32 %v116_v22, %v68_v21  ;;  %v165_v34 = vand.u32 2147483648, %v714_v15  ;;  %v118_v35 = vmul.f32 %v94_v26, %v94_v26  ;;  %v97_v47 = vld [vmem:[#allocation5 + $0x48] sm:$0xff]  ;;  %v98_v51 = vld [vmem:[#allocation5 + $0x50] sm:$0xff]  ;;  %v51_v10 = vld [vmem:[#allocation2 + $0x58] sm:$0xff]  ;;  %p644_p6 = pnand %p643_p5, %p637_p2 }
  0x2e   :  { %500 = vrsqrt.f32 %v718_v20  ;;  %v71_v36 = vmul.f32 %v47_v27, %v47_v27  ;;  %v119_v37 = vmul.f32 %v95_v28, %v95_v28  ;;  %vm169_vm2 = vcmp.eq.f32.partialorder %v716_v19, inf  ;;  %v99_v28 = vld [vmem:[#allocation5 + $0x58] sm:$0xff] }
  0x2f   :  { %vm171_vm3 = vcmp.eq.f32.partialorder %v716_v19, 0.0  ;;  %v172_v39 = vand.u32 2147483648, %v716_v19  ;;  %502 = vrsqrt.f32 %v725_v30  ;;  %vm176_vm4 = vcmp.eq.f32.partialorder %v718_v20, inf }
  0x30   :  { %vm178_vm5 = vcmp.eq.f32.partialorder %v718_v20, 0.0  ;;  %v179_v41 = vand.u32 2147483648, %v718_v20  ;;  %504 = vrsqrt.f32 %v727_v31  ;;  %v738_v42 = vadd.f32 %v117_v32, %v69_v29 }
  0x31   :  { %v740_v43 = vadd.f32 %v118_v35, %v70_v33  ;;  %v742_v44 = vadd.f32 %v119_v37, %v71_v36  ;;  %v72_v45 = vmul.f32 %v48_v38, %v48_v38  ;;  %vm183_vm6 = vcmp.eq.f32.partialorder %v725_v30, inf }
  0x32   :  { %vm185_vm7 = vcmp.eq.f32.partialorder %v725_v30, 0.0  ;;  %v186_v49 = vand.u32 2147483648, %v725_v30  ;;  %v120_v50 = vmul.f32 %v96_v40, %v96_v40  ;;  %vm190_vm8 = vcmp.eq.f32.partialorder %v727_v31, inf }
  0x33   :  { %vm192_vm9 = vcmp.eq.f32.partialorder %v727_v31, 0.0  ;;  %v193_v52 = vand.u32 2147483648, %v727_v31  ;;  %506 = vrsqrt.f32 %v738_v42  ;;  %v73_v54 = vmul.f32 %v49_v46, %v49_v46 }
  0x34   :  { %508 = vrsqrt.f32 %v740_v43  ;;  %v121_v55 = vmul.f32 %v97_v47, %v97_v47  ;;  %v74_v56 = vmul.f32 %v50_v48, %v50_v48  ;;  %vm197_vm10 = vcmp.eq.f32.partialorder %v738_v42, inf }
  0x35   :  { %510 = vrsqrt.f32 %v742_v44  ;;  %v122_v59 = vmul.f32 %v98_v51, %v98_v51  ;;  %vm199_vm11 = vcmp.eq.f32.partialorder %v738_v42, 0.0  ;;  %v200_v62 = vand.u32 2147483648, %v738_v42 }
  0x36   :  { %v497_v53 = vpop.eup %496  ;;  %vm204_vm12 = vcmp.eq.f32.partialorder %v740_v43, inf  ;;  %v759_v63 = vadd.f32 %v120_v50, %v72_v45  ;;  %vm206_vm13 = vcmp.eq.f32.partialorder %v740_v43, 0.0  ;;  %v207_v2 = vand.u32 2147483648, %v740_v43 }
  0x37   :  { %v499_v57 = vpop.eup %498  ;;  %v161_v58 = vmul.f32 %v497_v53, %v714_v15  ;;  %vm211_vm14 = vcmp.eq.f32.partialorder %v742_v44, inf  ;;  %vm213_vm15 = vcmp.eq.f32.partialorder %v742_v44, 0.0  ;;  %v214_v9 = vand.u32 2147483648, %v742_v44 }
  0x38   :  { %v501_v60 = vpop.eup %500  ;;  %v168_v61 = vmul.f32 %v499_v57, %v716_v19  ;;  %512 = vrsqrt.f32 %v759_v63  ;;  %v787_v18 = vadd.f32 %v122_v59, %v74_v56  ;;  %v75_v21 = vmul.f32 %v51_v10, %v51_v10 }
  0x39   :  { %v163_v0 = vsel %vm162_vm0, %v714_v15, %v161_v58  ;;  %v175_v1 = vmul.f32 %v501_v60, %v718_v20  ;;  %v503_v5 = vpop.eup %502  ;;  %v784_v15 = vadd.f32 %v121_v55, %v73_v54  ;;  %vm218_vm0 = vcmp.eq.f32.partialorder %v759_v63, inf  ;;  %v101_v58 = vld [vmem:[#allocation5 + $0x68] sm:$0xff] }
  0x3a   :  { %v166_v3 = vsel %vm164_vm1, %v165_v34, %v163_v0  ;;  %v170_v4 = vsel %vm169_vm2, %v716_v19, %v168_v61  ;;  %v505_v11 = vpop.eup %504  ;;  %v182_v14 = vmul.f32 %v503_v5, %v725_v30  ;;  %vm220_vm1 = vcmp.eq.f32.partialorder %v759_v63, 0.0  ;;  %v52_v34 = vld [vmem:[#allocation2 + $0x60] sm:$0xff] }
  0x3b   :  { %v328_v6 = vadd.f32 1e-07, %v166_v3  ;;  %v173_v7 = vsel %vm171_vm3, %v172_v39, %v170_v4  ;;  %v177_v8 = vsel %vm176_vm4, %v718_v20, %v175_v1  ;;  %v189_v17 = vmul.f32 %v505_v11, %v727_v31  ;;  %v100_v39 = vld [vmem:[#allocation5 + $0x60] sm:$0xff] }
  0x3c   :  { %v329_v12 = vadd.f32 1e-07, %v173_v7  ;;  %v180_v13 = vsel %vm178_vm5, %v179_v41, %v177_v8  ;;  %v184_v19 = vsel %vm183_vm6, %v725_v30, %v182_v14  ;;  %v221_v33 = vand.u32 2147483648, %v759_v63 }
  0x3d   :  { %514 = vlog2.f32 %v328_v6  ;;  %v330_v16 = vadd.f32 1e-07, %v180_v13  ;;  %v507_v20 = vpop.eup %506  ;;  %v187_v22 = vsel %vm185_vm7, %v186_v49, %v184_v19  ;;  %v191_v23 = vsel %vm190_vm8, %v727_v31, %v189_v17  ;;  %v102_v19 = vld [vmem:[#allocation5 + $0x70] sm:$0xff] }
  0x3e   :  { %516 = vlog2.f32 %v329_v12  ;;  %v509_v24 = vpop.eup %508  ;;  %v331_v25 = vadd.f32 1e-07, %v187_v22  ;;  %v194_v26 = vsel %vm192_vm9, %v193_v52, %v191_v23  ;;  %v196_v27 = vmul.f32 %v507_v20, %v738_v42  ;;  %v54_v12 = vld [vmem:[#allocation2 + $0x70] sm:$0xff] }
  0x3f   :  { %518 = vlog2.f32 %v330_v16  ;;  %v511_v29 = vpop.eup %510  ;;  %v332_v32 = vadd.f32 1e-07, %v194_v26  ;;  %v203_v30 = vmul.f32 %v509_v24, %v740_v43  ;;  %vm225_vm2 = vcmp.eq.f32.partialorder %v784_v15, inf }
  0x40   :  { %520 = vrsqrt.f32 %v784_v15  ;;  %v198_v31 = vsel %vm197_vm10, %v738_v42, %v196_v27  ;;  %v210_v35 = vmul.f32 %v511_v29, %v742_v44  ;;  %v123_v38 = vmul.f32 %v99_v28, %v99_v28 }
  0x41   :  { %522 = vrsqrt.f32 %v787_v18  ;;  %v201_v36 = vsel %vm199_vm11, %v200_v62, %v198_v31  ;;  %v205_v37 = vsel %vm204_vm12, %v740_v43, %v203_v30  ;;  %v76_v47 = vmul.f32 %v52_v34, %v52_v34 }
  0x42   :  { %524 = vlog2.f32 %v331_v25  ;;  %v513_v40 = vpop.eup %512  ;;  %v333_v41 = vadd.f32 1e-07, %v201_v36  ;;  %v208_v45 = vsel %vm206_vm13, %v207_v2, %v205_v37  ;;  %v212_v46 = vsel %vm211_vm14, %v742_v44, %v210_v35  ;;  %v53_v44 = vld [vmem:[#allocation2 + $0x68] sm:$0xff]  ;;  %v55_v35 = vld [vmem:[#allocation2 + $0x78] sm:$0xff] }
  0x43   :  { %526 = vlog2.f32 %v332_v32  ;;  %v334_v48 = vadd.f32 1e-07, %v208_v45  ;;  %v215_v42 = vsel %vm213_vm15, %v214_v9, %v212_v46  ;;  %v217_v49 = vmul.f32 %v513_v40, %v759_v63 }
  0x44   :  { %v824_v50 = vadd.f32 %v123_v38, %v75_v21  ;;  %528 = vlog2.f32 %v333_v41  ;;  %v335_v51 = vadd.f32 1e-07, %v215_v42  ;;  %vm227_vm3 = vcmp.eq.f32.partialorder %v784_v15, 0.0 }
  0x45   :  { %v124_v52 = vmul.f32 %v100_v39, %v100_v39  ;;  %530 = vlog2.f32 %v334_v48  ;;  %v219_v53 = vsel %vm218_vm0, %v759_v63, %v217_v49  ;;  %v228_v54 = vand.u32 2147483648, %v784_v15  ;;  %v103_v39 = vld [vmem:[#allocation5 + $0x78] sm:$0xff] }
  0x46   :  { %vm232_vm4 = vcmp.eq.f32.partialorder %v787_v18, inf  ;;  %532 = vlog2.f32 %v335_v51  ;;  %v222_v57 = vsel %vm220_vm1, %v221_v33, %v219_v53  ;;  %vm234_vm5 = vcmp.eq.f32.partialorder %v787_v18, 0.0 }
  0x47   :  { %v515_v43 = vpop.eup %514  ;;  %v336_v61 = vadd.f32 1e-07, %v222_v57  ;;  %534 = vrsqrt.f32 %v824_v50  ;;  %v836_v62 = vadd.f32 %v124_v52, %v76_v47  ;;  %v235_v3 = vand.u32 2147483648, %v787_v18 }
  0x48   :  { %v517_v55 = vpop.eup %516  ;;  %v353_v56 = vmul.f32 0.6931472, %v515_v43  ;;  %v77_v4 = vmul.f32 %v53_v44, %v53_v44  ;;  %v125_v7 = vmul.f32 %v101_v58, %v101_v58  ;;  %vm239_vm6 = vcmp.eq.f32.partialorder %v824_v50, inf  ;;  %v104_v58 = vld [vmem:[#allocation5 + $0x80] sm:$0xff] }
  0x49   :  { %v519_v59 = vpop.eup %518  ;;  %v355_v60 = vmul.f32 0.6931472, %v517_v55  ;;  %536 = vlog2.f32 %v336_v61  ;;  %v78_v27 = vmul.f32 %v54_v12, %v54_v12  ;;  %v126_v33 = vmul.f32 %v102_v19, %v102_v19 }
  0x4a   :  { %v521_v0 = vpop.eup %520  ;;  %v400_v1 = vmul.f32 20.0, %v353_v56  ;;  %v357_v2 = vmul.f32 0.6931472, %v519_v59  ;;  %538 = vrsqrt.f32 %v836_v62  ;;  %v853_v30 = vadd.f32 %v125_v7, %v77_v4  ;;  %v57_v59 = vld [vmem:[#allocation2 + $0x88] sm:$0xff] }
  0x4b   :  { %v523_v5 = vpop.eup %522  ;;  %v401_v6 = vmul.f32 20.0, %v355_v60  ;;  %v224_v63 = vmul.f32 %v521_v0, %v784_v15  ;;  %vm241_vm7 = vcmp.eq.f32.partialorder %v824_v50, 0.0  ;;  %vm246_vm8 = vcmp.eq.f32.partialorder %v836_v62, inf }
  0x4c   :  { %v525_v8 = vpop.eup %524  ;;  %v425_v9 = vmul.f32 0.003921569, %v400_v1  ;;  %v402_v10 = vmul.f32 20.0, %v357_v2  ;;  %v231_v11 = vmul.f32 %v523_v5, %v787_v18  ;;  %v249_v48 = vand.u32 2147483648, %v836_v62  ;;  %v105_v1 = vld [vmem:[#allocation5 + $0x88] sm:$0xff] }
  0x4d   :  { %v527_v13 = vpop.eup %526  ;;  %v426_v14 = vmul.f32 0.003921569, %v401_v6  ;;  %v359_v16 = vmul.f32 0.6931472, %v525_v8  ;;  %v226_v17 = vsel %vm225_vm2, %v784_v15, %v224_v63  ;;  %v861_v42 = vadd.f32 %v126_v33, %v78_v27 }
  0x4e   :  { %449 = vst [vmem:[#allocation7] sm:$0xff] %v425_v9  ;;  %v427_v21 = vmul.f32 0.003921569, %v402_v10  ;;  %v361_v20 = vmul.f32 0.6931472, %v527_v13  ;;  %v229_v22 = vsel %vm227_vm3, %v228_v54, %v226_v17  ;;  %v233_v23 = vsel %vm232_vm4, %v787_v18, %v231_v11  ;;  %v529_v28 = vpop.eup %528  ;;  %v56_v54 = vld [vmem:[#allocation2 + $0x80] sm:$0xff] }
  0x4f   :  { %450 = vst [vmem:[#allocation7 + $0x8] sm:$0xff] %v426_v14  ;;  %v403_v24 = vmul.f32 20.0, %v359_v16  ;;  %v337_v25 = vadd.f32 1e-07, %v229_v22  ;;  %v236_v26 = vsel %vm234_vm5, %v235_v3, %v233_v23  ;;  %v531_v15 = vpop.eup %530  ;;  %v363_v31 = vmul.f32 0.6931472, %v529_v28 }
  0x50   :  { %451 = vst [vmem:[#allocation7 + $0x10] sm:$0xff] %v427_v21  ;;  %v404_v29 = vmul.f32 20.0, %v361_v20  ;;  %v338_v32 = vadd.f32 1e-07, %v236_v26  ;;  %v533_v36 = vpop.eup %532  ;;  %v365_v38 = vmul.f32 0.6931472, %v531_v15  ;;  %v79_v43 = vmul.f32 %v55_v35, %v55_v35 }
  0x51   :  { %v428_v34 = vmul.f32 0.003921569, %v403_v24  ;;  %540 = vlog2.f32 %v337_v25  ;;  %v242_v18 = vand.u32 2147483648, %v824_v50  ;;  %v535_v40 = vpop.eup %534  ;;  %v405_v41 = vmul.f32 20.0, %v363_v31  ;;  %v58_v10 = vld [vmem:[#allocation2 + $0x90] sm:$0xff]  ;;  %v59_v28 = vld [vmem:[#allocation2 + $0x98] sm:$0xff] }
  0x52   :  { %v429_v37 = vmul.f32 0.003921569, %v404_v29  ;;  %542 = vlog2.f32 %v338_v32  ;;  %v367_v45 = vmul.f32 0.6931472, %v533_v36  ;;  %v406_v46 = vmul.f32 20.0, %v365_v38  ;;  %v106_v13 = vld [vmem:[#allocation5 + $0x90] sm:$0xff] }
  0x53   :  { %452 = vst [vmem:[#allocation7 + $0x18] sm:$0xff] %v428_v34  ;;  %544 = vrsqrt.f32 %v853_v30  ;;  %v238_v47 = vmul.f32 %v535_v40, %v824_v50  ;;  %v537_v49 = vpop.eup %536  ;;  %v430_v51 = vmul.f32 0.003921569, %v405_v41  ;;  %v127_v53 = vmul.f32 %v103_v39, %v103_v39  ;;  %v107_v29 = vld [vmem:[#allocation5 + $0x98] sm:$0xff]  ;;  %v60_v34 = vld [vmem:[#allocation2 + $0xa0] sm:$0xff] }
  0x54   :  { %453 = vst [vmem:[#allocation7 + $0x20] sm:$0xff] %v429_v37  ;;  %v407_v52 = vmul.f32 20.0, %v367_v45  ;;  %v539_v44 = vpop.eup %538  ;;  %v431_v55 = vmul.f32 0.003921569, %v406_v46  ;;  %v369_v56 = vmul.f32 0.6931472, %v537_v49  ;;  %546 = vrsqrt.f32 %v861_v42 }
  0x55   :  { %v240_v57 = vsel %vm239_vm6, %v824_v50, %v238_v47  ;;  %454 = vst [vmem:[#allocation7 + $0x28] sm:$0xff] %v430_v51  ;;  %v245_v0 = vmul.f32 %v539_v44, %v836_v62  ;;  %vm248_vm9 = vcmp.eq.f32.partialorder %v836_v62, 0.0  ;;  %v80_v4 = vmul.f32 %v56_v54, %v56_v54  ;;  %v108_v31 = vld [vmem:[#allocation5 + $0xa0] sm:$0xff]  ;;  %v61_v51 = vld [vmem:[#allocation2 + $0xa8] sm:$0xff] }
  0x56   :  { %v432_v60 = vmul.f32 0.003921569, %v407_v52  ;;  %v243_v61 = vsel %vm241_vm7, %v242_v18, %v240_v57  ;;  %455 = vst [vmem:[#allocation7 + $0x30] sm:$0xff] %v431_v55  ;;  %v408_v2 = vmul.f32 20.0, %v369_v56  ;;  %v874_v6 = vadd.f32 %v127_v53, %v79_v43  ;;  %v109_v54 = vld [vmem:[#allocation5 + $0xa8] sm:$0xff]  ;;  %v62_v56 = vld [vmem:[#allocation2 + $0xb0] sm:$0xff] }
  0x57   :  { %v339_v3 = vadd.f32 1e-07, %v243_v61  ;;  %v247_v5 = vsel %vm246_vm8, %v836_v62, %v245_v0  ;;  %v128_v63 = vmul.f32 %v104_v58, %v104_v58  ;;  %v81_v7 = vmul.f32 %v57_v59, %v57_v59  ;;  %v110_v61 = vld [vmem:[#allocation5 + $0xb0] sm:$0xff] }
  0x58   :  { %456 = vst [vmem:[#allocation7 + $0x38] sm:$0xff] %v432_v60  ;;  %v433_v50 = vmul.f32 0.003921569, %v408_v2  ;;  %v250_v8 = vsel %vm248_vm9, %v249_v48, %v247_v5  ;;  %v129_v9 = vmul.f32 %v105_v1, %v105_v1  ;;  %vm253_vm10 = vcmp.eq.f32.partialorder %v853_v30, inf }
  0x59   :  { %548 = vlog2.f32 %v339_v3  ;;  %v340_v12 = vadd.f32 1e-07, %v250_v8  ;;  %vm255_vm11 = vcmp.eq.f32.partialorder %v853_v30, 0.0  ;;  %v256_v16 = vand.u32 2147483648, %v853_v30 }
  0x5a   :  { %550 = vrsqrt.f32 %v874_v6  ;;  %457 = vst [vmem:[#allocation7 + $0x40] sm:$0xff] %v433_v50  ;;  %v880_v17 = vadd.f32 %v128_v63, %v80_v4  ;;  %v882_v19 = vadd.f32 %v129_v9, %v81_v7  ;;  %vm260_vm12 = vcmp.eq.f32.partialorder %v861_v42, inf }
  0x5b   :  { %v541_v11 = vpop.eup %540  ;;  %552 = vlog2.f32 %v340_v12  ;;  %v82_v22 = vmul.f32 %v58_v10, %v58_v10  ;;  %v130_v25 = vmul.f32 %v106_v13, %v106_v13  ;;  %vm262_vm13 = vcmp.eq.f32.partialorder %v861_v42, 0.0  ;;  %v63_v13 = vld [vmem:[#allocation2 + $0xb8] sm:$0xff] }
  0x5c   :  { %v543_v14 = vpop.eup %542  ;;  %v371_v62 = vmul.f32 0.6931472, %v541_v11  ;;  %554 = vrsqrt.f32 %v880_v17  ;;  %v263_v27 = vand.u32 2147483648, %v861_v42  ;;  %vm267_vm14 = vcmp.eq.f32.partialorder %v874_v6, inf }
  0x5d   :  { %v545_v21 = vpop.eup %544  ;;  %v373_v20 = vmul.f32 0.6931472, %v543_v14  ;;  %556 = vrsqrt.f32 %v882_v19  ;;  %vm269_vm15 = vcmp.eq.f32.partialorder %v874_v6, 0.0  ;;  %v270_v38 = vand.u32 2147483648, %v874_v6  ;;  %v111_v14 = vld [vmem:[#allocation5 + $0xb8] sm:$0xff] }
  0x5e   :  { %v409_v23 = vmul.f32 20.0, %v371_v62  ;;  %v252_v24 = vmul.f32 %v545_v21, %v853_v30  ;;  %v547_v32 = vpop.eup %546  ;;  %v899_v39 = vadd.f32 %v130_v25, %v82_v22  ;;  %v83_v40 = vmul.f32 %v59_v28, %v59_v28 }
  0x5f   :  { %v410_v26 = vmul.f32 20.0, %v373_v20  ;;  %v259_v37 = vmul.f32 %v547_v32, %v861_v42  ;;  %v131_v41 = vmul.f32 %v107_v29, %v107_v29  ;;  %vm274_vm0 = vcmp.eq.f32.partialorder %v880_v17, inf }
  0x60   :  { %v434_v33 = vmul.f32 0.003921569, %v409_v23  ;;  %v254_v15 = vsel %vm253_vm10, %v853_v30, %v252_v24  ;;  %v84_v46 = vmul.f32 %v60_v34, %v60_v34  ;;  %v132_v30 = vmul.f32 %v108_v31, %v108_v31 }
  0x61   :  { %v435_v35 = vmul.f32 0.003921569, %v410_v26  ;;  %v257_v36 = vsel %vm255_vm11, %v256_v16, %v254_v15  ;;  %v261_v45 = vsel %vm260_vm12, %v861_v42, %v259_v37  ;;  %vm276_vm1 = vcmp.eq.f32.partialorder %v880_v17, 0.0 }
  0x62   :  { %458 = vst [vmem:[#allocation7 + $0x48] sm:$0xff] %v434_v33  ;;  %v341_v18 = vadd.f32 1e-07, %v257_v36  ;;  %v264_v48 = vsel %vm262_vm13, %v263_v27, %v261_v45  ;;  %v277_v49 = vand.u32 2147483648, %v880_v17  ;;  %vm281_vm2 = vcmp.eq.f32.partialorder %v882_v19, inf }
  0x63   :  { %459 = vst [vmem:[#allocation7 + $0x50] sm:$0xff] %v435_v35  ;;  %v549_v47 = vpop.eup %548  ;;  %v342_v53 = vadd.f32 1e-07, %v264_v48  ;;  %vm283_vm3 = vcmp.eq.f32.partialorder %v882_v19, 0.0  ;;  %v284_v42 = vand.u32 2147483648, %v882_v19  ;;  %v914_v55 = vadd.f32 %v131_v41, %v83_v40 }
  0x64   :  { %558 = vlog2.f32 %v341_v18  ;;  %v551_v52 = vpop.eup %550  ;;  %v375_v43 = vmul.f32 0.6931472, %v549_v47  ;;  %v916_v59 = vadd.f32 %v132_v30, %v84_v46  ;;  %v85_v60 = vmul.f32 %v61_v51, %v61_v51 }
  0x65   :  { %560 = vrsqrt.f32 %v899_v39  ;;  %v266_v44 = vmul.f32 %v551_v52, %v874_v6  ;;  %v553_v57 = vpop.eup %552  ;;  %v133_v3 = vmul.f32 %v109_v54, %v109_v54  ;;  %v86_v50 = vmul.f32 %v62_v56, %v62_v56 }
  0x66   :  { %v411_v58 = vmul.f32 20.0, %v375_v43  ;;  %562 = vlog2.f32 %v342_v53  ;;  %v555_v0 = vpop.eup %554  ;;  %v377_v1 = vmul.f32 0.6931472, %v553_v57  ;;  %v134_v11 = vmul.f32 %v110_v61, %v110_v61 }
  0x67   :  { %v268_v2 = vsel %vm267_vm14, %v874_v6, %v266_v44  ;;  %564 = vrsqrt.f32 %v914_v55  ;;  %v557_v4 = vpop.eup %556  ;;  %v273_v7 = vmul.f32 %v555_v0, %v880_v17  ;;  %v937_v22 = vadd.f32 %v133_v3, %v85_v60 }
  0x68   :  { %v436_v5 = vmul.f32 0.003921569, %v411_v58  ;;  %v271_v63 = vsel %vm269_vm15, %v270_v38, %v268_v2  ;;  %v412_v8 = vmul.f32 20.0, %v377_v1  ;;  %v280_v10 = vmul.f32 %v557_v4, %v882_v19 }
  0x69   :  { %v343_v9 = vadd.f32 1e-07, %v271_v63  ;;  %v275_v12 = vsel %vm274_vm0, %v880_v17, %v273_v7  ;;  %566 = vrsqrt.f32 %v916_v59  ;;  %v939_v25 = vadd.f32 %v134_v11, %v86_v50 }
  0x6a   :  { %460 = vst [vmem:[#allocation7 + $0x58] sm:$0xff] %v436_v5  ;;  %v437_v62 = vmul.f32 0.003921569, %v412_v8  ;;  %v278_v6 = vsel %vm276_vm1, %v277_v49, %v275_v12  ;;  %v282_v16 = vsel %vm281_vm2, %v882_v19, %v280_v10  ;;  %v87_v26 = vmul.f32 %v63_v13, %v63_v13 }
  0x6b   :  { %568 = vlog2.f32 %v343_v9  ;;  %v344_v21 = vadd.f32 1e-07, %v278_v6  ;;  %v285_v20 = vsel %vm283_vm3, %v284_v42, %v282_v16  ;;  %v135_v27 = vmul.f32 %v111_v14, %v111_v14 }
  0x6c   :  { %461 = vst [vmem:[#allocation7 + $0x60] sm:$0xff] %v437_v62  ;;  %v345_v24 = vadd.f32 1e-07, %v285_v20  ;;  %vm288_vm4 = vcmp.eq.f32.partialorder %v899_v39, inf  ;;  %v291_v29 = vand.u32 2147483648, %v899_v39  ;;  %vm290_vm5 = vcmp.eq.f32.partialorder %v899_v39, 0.0 }
  0x6d   :  { %570 = vlog2.f32 %v344_v21  ;;  %vm295_vm6 = vcmp.eq.f32.partialorder %v914_v55, inf  ;;  %v298_v15 = vand.u32 2147483648, %v914_v55  ;;  %v950_v36 = vadd.f32 %v135_v27, %v87_v26 }
  0x6e   :  { %v559_v23 = vpop.eup %558  ;;  %572 = vlog2.f32 %v345_v24  ;;  %vm297_vm7 = vcmp.eq.f32.partialorder %v914_v55, 0.0  ;;  %vm302_vm8 = vcmp.eq.f32.partialorder %v916_v59, inf  ;;  %vm304_vm9 = vcmp.eq.f32.partialorder %v916_v59, 0.0 }
  0x6f   :  { %v561_v28 = vpop.eup %560  ;;  %v379_v17 = vmul.f32 0.6931472, %v559_v23  ;;  %574 = vrsqrt.f32 %v937_v22  ;;  %v305_v46 = vand.u32 2147483648, %v916_v59  ;;  %vm309_vm10 = vcmp.eq.f32.partialorder %v937_v22, inf }
  0x70   :  { %v287_v19 = vmul.f32 %v561_v28, %v899_v39  ;;  %v563_v32 = vpop.eup %562  ;;  %576 = vrsqrt.f32 %v939_v25  ;;  %vm311_vm11 = vcmp.eq.f32.partialorder %v937_v22, 0.0  ;;  %v312_v61 = vand.u32 2147483648, %v937_v22 }
  0x71   :  { %v413_v33 = vmul.f32 20.0, %v379_v17  ;;  %v565_v34 = vpop.eup %564  ;;  %v381_v31 = vmul.f32 0.6931472, %v563_v32  ;;  %578 = vrsqrt.f32 %v950_v36  ;;  %vm316_vm12 = vcmp.eq.f32.partialorder %v939_v25, inf }
  0x72   :  { %v289_v35 = vsel %vm288_vm4, %v899_v39, %v287_v19  ;;  %v294_v18 = vmul.f32 %v565_v34, %v914_v55  ;;  %v319_v2 = vand.u32 2147483648, %v939_v25  ;;  %vm318_vm13 = vcmp.eq.f32.partialorder %v939_v25, 0.0 }
  0x73   :  { %v438_v37 = vmul.f32 0.003921569, %v413_v33  ;;  %v292_v38 = vsel %vm290_vm5, %v291_v29, %v289_v35  ;;  %v414_v40 = vmul.f32 20.0, %v381_v31  ;;  %v567_v45 = vpop.eup %566  ;;  %vm323_vm14 = vcmp.eq.f32.partialorder %v950_v36, inf }
  0x74   :  { %v346_v41 = vadd.f32 1e-07, %v292_v38  ;;  %v296_v39 = vsel %vm295_vm6, %v914_v55, %v294_v18  ;;  %v301_v49 = vmul.f32 %v567_v45, %v916_v59  ;;  %vm325_vm15 = vcmp.eq.f32.partialorder %v950_v36, 0.0 }
  0x75   :  { %462 = vst [vmem:[#allocation7 + $0x68] sm:$0xff] %v438_v37  ;;  %v569_v30 = vpop.eup %568  ;;  %v439_v47 = vmul.f32 0.003921569, %v414_v40  ;;  %v299_v48 = vsel %vm297_vm7, %v298_v15, %v296_v39  ;;  %v326_v50 = vand.u32 2147483648, %v950_v36 }
  0x76   :  { %580 = vlog2.f32 %v346_v41  ;;  %v383_v51 = vmul.f32 0.6931472, %v569_v30  ;;  %v347_v52 = vadd.f32 1e-07, %v299_v48  ;;  %v303_v43 = vsel %vm302_vm8, %v916_v59, %v301_v49 }
  0x77   :  { %463 = vst [vmem:[#allocation7 + $0x70] sm:$0xff] %v439_v47  ;;  %v571_v53 = vpop.eup %570  ;;  %v306_v44 = vsel %vm304_vm9, %v305_v46, %v303_v43 }
  0x78   :  { %v415_v54 = vmul.f32 20.0, %v383_v51  ;;  %582 = vlog2.f32 %v347_v52  ;;  %v573_v42 = vpop.eup %572  ;;  %v385_v55 = vmul.f32 0.6931472, %v571_v53  ;;  %v348_v56 = vadd.f32 1e-07, %v306_v44 }
  0x79   :  { %v575_v57 = vpop.eup %574  ;;  %v387_v60 = vmul.f32 0.6931472, %v573_v42 }
  0x7a   :  { %v440_v58 = vmul.f32 0.003921569, %v415_v54  ;;  %v577_v0 = vpop.eup %576  ;;  %v416_v59 = vmul.f32 20.0, %v385_v55  ;;  %584 = vlog2.f32 %v348_v56  ;;  %v308_v1 = vmul.f32 %v575_v57, %v937_v22 }
  0x7b   :  { %v417_v3 = vmul.f32 20.0, %v387_v60  ;;  %v315_v4 = vmul.f32 %v577_v0, %v939_v25  ;;  %v579_v5 = vpop.eup %578 }
  0x7c   :  { %464 = vst [vmem:[#allocation7 + $0x78] sm:$0xff] %v440_v58  ;;  %v441_v63 = vmul.f32 0.003921569, %v416_v59  ;;  %v310_v7 = vsel %vm309_vm10, %v937_v22, %v308_v1  ;;  %v322_v11 = vmul.f32 %v579_v5, %v950_v36 }
  0x7d   :  { %v442_v8 = vmul.f32 0.003921569, %v417_v3  ;;  %v313_v9 = vsel %vm311_vm11, %v312_v61, %v310_v7  ;;  %v317_v10 = vsel %vm316_vm12, %v939_v25, %v315_v4 }
  0x7e   :  { %465 = vst [vmem:[#allocation7 + $0x80] sm:$0xff] %v441_v63  ;;  %v349_v13 = vadd.f32 1e-07, %v313_v9  ;;  %v320_v14 = vsel %vm318_vm13, %v319_v2, %v317_v10  ;;  %v324_v16 = vsel %vm323_vm14, %v950_v36, %v322_v11 }
  0x7f   :  { %466 = vst [vmem:[#allocation7 + $0x88] sm:$0xff] %v442_v8  ;;  %v350_v6 = vadd.f32 1e-07, %v320_v14  ;;  %v327_v21 = vsel %vm325_vm15, %v326_v50, %v324_v16 }
  0x80   :  { %v581_v12 = vpop.eup %580  ;;  %586 = vlog2.f32 %v349_v13  ;;  %v351_v23 = vadd.f32 1e-07, %v327_v21 }
  0x81   :  { %v389_v62 = vmul.f32 0.6931472, %v581_v12  ;;  %588 = vlog2.f32 %v350_v6 }
  0x82   :  { %v583_v20 = vpop.eup %582  ;;  %590 = vlog2.f32 %v351_v23 }
  0x83   :  { %v418_v22 = vmul.f32 20.0, %v389_v62  ;;  %v391_v24 = vmul.f32 0.6931472, %v583_v20 }
  0x84   :  { %v585_v26 = vpop.eup %584 }
  0x85   :  { %v443_v25 = vmul.f32 0.003921569, %v418_v22  ;;  %v419_v27 = vmul.f32 20.0, %v391_v24  ;;  %v393_v28 = vmul.f32 0.6931472, %v585_v26 }
  0x87   :  { %467 = vst [vmem:[#allocation7 + $0x90] sm:$0xff] %v443_v25  ;;  %v444_v17 = vmul.f32 0.003921569, %v419_v27  ;;  %v420_v29 = vmul.f32 20.0, %v393_v28 }
  0x89   :  { %468 = vst [vmem:[#allocation7 + $0x98] sm:$0xff] %v444_v17  ;;  %v445_v19 = vmul.f32 0.003921569, %v420_v29 }
  0x8a   :  { %v587_v32 = vpop.eup %586 }
  0x8b   :  { %v589_v33 = vpop.eup %588  ;;  %469 = vst [vmem:[#allocation7 + $0xa0] sm:$0xff] %v445_v19  ;;  %v395_v15 = vmul.f32 0.6931472, %v587_v32 }
  0x8c   :  { %v397_v34 = vmul.f32 0.6931472, %v589_v33  ;;  %v591_v31 = vpop.eup %590 }
  0x8d   :  { %v421_v35 = vmul.f32 20.0, %v395_v15  ;;  %v399_v37 = vmul.f32 0.6931472, %v591_v31 }
  0x8e   :  { %v422_v36 = vmul.f32 20.0, %v397_v34 }
  0x8f   :  { %v446_v38 = vmul.f32 0.003921569, %v421_v35  ;;  %v423_v40 = vmul.f32 20.0, %v399_v37 }
  0x90   :  { %v447_v18 = vmul.f32 0.003921569, %v422_v36 }
  0x91   :  { %470 = vst [vmem:[#allocation7 + $0xa8] sm:$0xff] %v446_v38  ;;  %v448_v41 = vmul.f32 0.003921569, %v423_v40 }
  0x92   :  { %471 = vst [vmem:[#allocation7 + $0xb0] sm:$0xff] %v447_v18 }
  0x93   :  { %472 = vst [vmem:[#allocation7 + $0xb8] sm:$0xff] %v448_v41 }
  0x94   :  { %647 = shalt.err (!%p644_p6)
}
  0x95   :  { %s648_s10 = scalar_lea.hbm %s1003_s2, 3072 }
  0x96   :  { %p649_p7 = scmp.ne.s32.totalorder %s1003_s2, %s648_s10  ;;  %p652_p8 = scmp.lt.u32.totalorder %s648_s10, %s1003_s2 }
  0x98   :  { %p654_p9 = pnand %p652_p8, %p649_p7 }
  0x9a   :  { %657 = shalt.err (!%p654_p9)
}
  0x9b   :  { %484 = dma.vmem_to_hbm [thread:$0]  %s479_s6, 3072, %s1003_s2, [#allocation4], %s665_s19, %s665_s19, %s666_s20  }
  0x9c   :  { %662 = dma.done.wait [#allocation4], 3072  }
  0x9d   :  { %663 = vsyncadd [#allocation4], 4294964224 }
  0x9e   :  { %488 = vsyncpa [#allocation3], 1 }
  0x9f   :  { %489 = vsyncpa [#allocation6], 1 }
  0xa0   :  { %490 = vsyncpa [#allocation4], 1 }

</bundles_post_ra>
